<compile_context>
chip_gen: v5e
topology: v5e:2x2
jax: 0.10.0
libtpu: 0.0.40
codegen_flags: <defaults>
</compile_context>

<pallas_src>
import jax
import jax.numpy as jnp
from jax import lax
from jax.experimental import pallas as pl
from jax.experimental.pallas import tpu as pltpu
import numpy as np

_GN_EPS = 1e-5  # nn.GroupNorm default


def _shuffle_attn_kernel(p_ref, x_ref, o_ref):
    """p_ref: (TR, 3) f32 rows of (alpha, beta, gamma); x_ref/o_ref: (TR, HW)."""
    x = x_ref[...].astype(jnp.float32)             # f32 compute even for bf16 I/O
    alpha = p_ref[:, 0:1]                          # (TR, 1)
    beta = p_ref[:, 1:2]
    gamma = p_ref[:, 2:3]

    mean = jnp.mean(x, axis=-1, keepdims=True)     # (TR, 1)
    d = x - mean
    var = jnp.mean(d * d, axis=-1, keepdims=True)  # biased variance (matches GroupNorm)

    s = alpha * lax.rsqrt(var + _GN_EPS)           # per-row scale
    t = beta * mean + gamma - s * mean             # per-row offset
    gate = jax.nn.sigmoid(s * x + t)               # one FMA + EUP sigmoid
    o_ref[...] = (x * gate).astype(o_ref.dtype)


def _pick_tile_rows(n_rows, hw, itemsize, budget_bytes=4 << 20):
    """Largest multiple-of-8 divisor of n_rows whose (rows, hw) block fits budget.

    Prefers a choice leaving grid >= 2 (v7x megacore sharding). Falls back to the
    full row extent, which is always layout-legal.
    """
    max_rows = max(8, budget_bytes // max(1, hw * itemsize))
    cands = [d for d in range(8, n_rows + 1, 8) if n_rows % d == 0 and d <= max_rows]
    if not cands:
        return n_rows
    multi = [d for d in cands if n_rows // d >= 2]
    return max(multi) if multi else max(cands)


def shuffle_attention(x, params, groups):
    """x: (b, c, h, w) NCHW; params: (6, c//(2*groups), 1) rows =
    [cweight, cbias, sweight, sbias, gn_weight, gn_bias]."""
    b, c, h, w = x.shape
    cg = c // (2 * groups)
    hw = h * w
    n_rows = b * c

    # Fused activation: (b, c, h, w) -> (b*c, h*w). Free contiguous reshape;
    # no chunk / concat round-trips through HBM.
    x2d = x.reshape(n_rows, hw)

    # Tiny per-channel fused affine constants, tiled over batch*groups.
    cw, cb, sw, sb, gw, gb = (params[i, :, 0].astype(jnp.float32) for i in range(6))
    alpha = jnp.concatenate([jnp.zeros_like(cw), -(sw * gw)])   # (2*cg,)
    beta = jnp.concatenate([cw, jnp.zeros_like(sw)])
    gamma = jnp.concatenate([cb, sb - sw * gb])
    row_params = jnp.stack([alpha, beta, gamma], axis=-1)       # (2*cg, 3)
    row_params = jnp.tile(row_params, (b * groups, 1))          # (n_rows, 3)

    tr = _pick_tile_rows(n_rows, hw, x.dtype.itemsize)
    grid = (pl.cdiv(n_rows, tr),)  # tr divides n_rows by construction

    # Note: if H*W is not a multiple of 128 (e.g. 7x7 maps), the block is still
    # legal (full last dim) but stores are masked / not lane-dense.
    out2d = pl.pallas_call(
        _shuffle_attn_kernel,
        out_shape=jax.ShapeDtypeStruct((n_rows, hw), x.dtype),
        grid_spec=pltpu.PrefetchScalarGridSpec(
            num_scalar_prefetch=0,
            grid=grid,
            in_specs=[
                pl.BlockSpec((tr, 3), lambda i: (i, 0)),    # per-row (alpha,beta,gamma)
                pl.BlockSpec((tr, hw), lambda i: (i, 0)),   # activation rows
            ],
            out_specs=pl.BlockSpec((tr, hw), lambda i: (i, 0)),
        ),
        compiler_params=pltpu.CompilerParams(
            dimension_semantics=("parallel",),
            vmem_limit_bytes=48 * 1024 * 1024,
        ),
    )(row_params, x2d)

    out = out2d.reshape(b, c, h, w)
    # channel_shuffle(out, groups=2): stride-2 channel interleave is not
    # expressible as a BlockSpec block permutation -> plain JAX transpose.
    out = out.reshape(b, 2, c // 2, h, w).transpose(0, 2, 1, 3, 4).reshape(b, c, h, w)
    return out


def shuffle_attention_ref(x, params, groups):
    """Pure-JAX reference mirroring the PyTorch forward."""
    b, c, h, w = x.shape
    cg = c // (2 * groups)
    xr = x.reshape(b * groups, 2 * cg, h, w)
    x0, x1 = xr[:, :cg], xr[:, cg:]
    cw = params[0].reshape(1, cg, 1, 1)
    cb = params[1].reshape(1, cg, 1, 1)
    sw = params[2].reshape(1, cg, 1, 1)
    sb = params[3].reshape(1, cg, 1, 1)
    gw = params[4].reshape(1, cg, 1, 1)
    gb = params[5].reshape(1, cg, 1, 1)

    xn = jnp.mean(x0, axis=(2, 3), keepdims=True)
    xn = cw * xn + cb
    xn = x0 * jax.nn.sigmoid(xn)

    mean = jnp.mean(x1, axis=(2, 3), keepdims=True)
    var = jnp.mean((x1 - mean) ** 2, axis=(2, 3), keepdims=True)
    xhat = (x1 - mean) / jnp.sqrt(var + _GN_EPS)
    gn = gw * xhat + gb
    xs = x1 * jax.nn.sigmoid(-sw * gn + sb)

    out = jnp.concatenate([xn, xs], axis=1).reshape(b, c, h, w)
    out = out.reshape(b, 2, c // 2, h, w).transpose(0, 2, 1, 3, 4).reshape(b, c, h, w)
    return out


if __name__ == "__main__":
    def make_params(cg):
        cweight = jnp.linspace(0.5, 1.5, cg, dtype=jnp.float32)
        cbias = jnp.linspace(-0.2, 0.2, cg, dtype=jnp.float32)
        sweight = jnp.linspace(0.3, 0.9, cg, dtype=jnp.float32)
        sbias = jnp.linspace(0.1, -0.1, cg, dtype=jnp.float32)
        gn_w = jnp.linspace(0.8, 1.2, cg, dtype=jnp.float32)
        gn_b = jnp.linspace(-0.05, 0.05, cg, dtype=jnp.float32)
        p = jnp.stack([cweight, cbias, sweight, sbias, gn_w, gn_b], axis=0)
        return p.reshape(6, cg, 1)

    key = jax.random.PRNGKey(0)
    # (b, c, h, w, groups); channels divisible by 2*groups as the module requires.
    for (b, c, h, w, groups) in [(2, 16, 16, 16, 4), (2, 64, 32, 32, 16)]:
        cg = c // (2 * groups)
        key, sub = jax.random.split(key)
        x = jax.random.normal(sub, (b, c, h, w), dtype=jnp.float32)
        params = make_params(cg)

        out = jax.block_until_ready(shuffle_attention(x, params, groups))
        ref = shuffle_attention_ref(x, params, groups)
        np.testing.assert_allclose(np.asarray(out), np.asarray(ref),
                                   rtol=1e-5, atol=1e-5)

    print("KERNEL_OK")
</pallas_src>

<mosaic_0001>
module attributes {stable_mosaic.version = 11 : i64} {
  func.func @_shuffle_attn_kernel(%arg0: i32, %arg1: memref<16x3xf32, #tpu.memory_space<vmem>>, %arg2: memref<16x256xf32, #tpu.memory_space<vmem>>, %arg3: memref<16x256xf32, #tpu.memory_space<vmem>>) attributes {dimension_semantics = [#tpu.dimension_semantics<parallel>], iteration_bounds = array<i64: 2>, scalar_prefetch = 0 : i64, scratch_operands = 0 : i64, tpu.core_type = #tpu.core_type<tc>, window_params = [{transform_indices = @transform_0, window_bounds = array<i64: 16, 3>}, {transform_indices = @transform_1, window_bounds = array<i64: 16, 256>}, {transform_indices = @transform_2, window_bounds = array<i64: 16, 256>}]} {
    %c0 = arith.constant 0 : index
    %c0_0 = arith.constant 0 : index
    %0 = vector.load %arg2[%c0, %c0_0] : memref<16x256xf32, #tpu.memory_space<vmem>>, vector<16x256xf32>
    %c0_1 = arith.constant 0 : index
    %c0_2 = arith.constant 0 : index
    %1 = vector.load %arg1[%c0_1, %c0_2] : memref<16x3xf32, #tpu.memory_space<vmem>>, vector<16x1xf32>
    %c0_3 = arith.constant 0 : index
    %c1 = arith.constant 1 : index
    %2 = vector.load %arg1[%c0_3, %c1] : memref<16x3xf32, #tpu.memory_space<vmem>>, vector<16x1xf32>
    %c0_4 = arith.constant 0 : index
    %c2 = arith.constant 2 : index
    %3 = vector.load %arg1[%c0_4, %c2] : memref<16x3xf32, #tpu.memory_space<vmem>>, vector<16x1xf32>
    %cst = arith.constant dense<0.000000e+00> : vector<16xf32>
    %4 = vector.multi_reduction <add>, %0, %cst [1] : vector<16x256xf32> to vector<16xf32>
    %5 = vector.shape_cast %4 : vector<16xf32> to vector<16x1xf32>
    %cst_5 = arith.constant 2.560000e+02 : f32
    %6 = vector.broadcast %cst_5 : f32 to vector<16x1xf32>
    %7 = arith.divf %5, %6 : vector<16x1xf32>
    %8 = vector.broadcast %7 : vector<16x1xf32> to vector<16x256xf32>
    %9 = arith.subf %0, %8 : vector<16x256xf32>
    %10 = arith.mulf %9, %9 : vector<16x256xf32>
    %cst_6 = arith.constant dense<0.000000e+00> : vector<16xf32>
    %11 = vector.multi_reduction <add>, %10, %cst_6 [1] : vector<16x256xf32> to vector<16xf32>
    %12 = vector.shape_cast %11 : vector<16xf32> to vector<16x1xf32>
    %cst_7 = arith.constant 2.560000e+02 : f32
    %13 = vector.broadcast %cst_7 : f32 to vector<16x1xf32>
    %14 = arith.divf %12, %13 : vector<16x1xf32>
    %cst_8 = arith.constant 9.99999974E-6 : f32
    %15 = vector.broadcast %cst_8 : f32 to vector<16x1xf32>
    %16 = arith.addf %14, %15 : vector<16x1xf32>
    %17 = math.rsqrt %16 : vector<16x1xf32>
    %18 = arith.mulf %1, %17 : vector<16x1xf32>
    %19 = arith.mulf %2, %7 : vector<16x1xf32>
    %20 = arith.addf %19, %3 : vector<16x1xf32>
    %21 = arith.mulf %18, %7 : vector<16x1xf32>
    %22 = arith.subf %20, %21 : vector<16x1xf32>
    %23 = vector.broadcast %18 : vector<16x1xf32> to vector<16x256xf32>
    %24 = arith.mulf %23, %0 : vector<16x256xf32>
    %25 = vector.broadcast %22 : vector<16x1xf32> to vector<16x256xf32>
    %26 = arith.addf %24, %25 : vector<16x256xf32>
    %27 = arith.negf %26 : vector<16x256xf32>
    %28 = math.exp %27 : vector<16x256xf32>
    %cst_9 = arith.constant 1.000000e+00 : f32
    %29 = vector.broadcast %cst_9 : f32 to vector<16x256xf32>
    %30 = arith.addf %29, %28 : vector<16x256xf32>
    %31 = arith.divf %29, %30 : vector<16x256xf32>
    %32 = arith.mulf %0, %31 : vector<16x256xf32>
    %c0_10 = arith.constant 0 : index
    %c0_11 = arith.constant 0 : index
    %33 = vector.load %arg3[%c0_10, %c0_11] : memref<16x256xf32, #tpu.memory_space<vmem>>, vector<16x256xf32>
    tpu.vector_store %arg3[%c0_10, %c0_11], %32 {strides = array<i32>} : memref<16x256xf32, #tpu.memory_space<vmem>>, vector<16x256xf32>,
    return
  }
  func.func @transform_0(%arg0: i32) -> (i32, i32) {
    %c0_i32 = arith.constant 0 : i32
    %c0_i32_0 = arith.constant 0 : i32
    return %arg0, %c0_i32 : i32, i32
  }
  func.func @transform_1(%arg0: i32) -> (i32, i32) {
    %c0_i32 = arith.constant 0 : i32
    %c0_i32_0 = arith.constant 0 : i32
    return %arg0, %c0_i32 : i32, i32
  }
  func.func @transform_2(%arg0: i32) -> (i32, i32) {
    %c0_i32 = arith.constant 0 : i32
    %c0_i32_0 = arith.constant 0 : i32
    return %arg0, %c0_i32 : i32, i32
  }
}

</mosaic_0001>

<bundles_post_ra>
// kernel: tpu_custom_call.1
= control target key start
LH: loop header
LB: loop body
LE: loop exit
PB: predicated region body
PF: predicated region fallthrough
CT: control target
= control target key end

     0   :  { %7 = vsyncpa [#allocation3], 0  ;;  %s892_s0 = inlined_call_operand.vmem [shape: f32[32,3], index: 0, kind: input, shape index: {}]   ;;  %s893_s1 = inlined_call_operand.hbm [shape: f32[32,256], index: 1, kind: input, shape index: {}]   ;;  %s894_s2 = inlined_call_operand.hbm [shape: f32[32,256], index: 2, kind: output, shape index: {}]  }
   0x1   :  { %9 = vsyncpa [#allocation3 + $0x1], 0 }
   0x2   :  { %10 = vsyncpa [#allocation4], 0 }
   0x3   :  { %12 = vsyncpa [#allocation4 + $0x1], 0  ;;  %s716_s9 = smov 0   ;;  %s718_s10 = smov 0  }
   0x4   :  { %s720_s11 = smov 0   ;;  %s722_s12 = smov 0  }
   0x5 LB: > { %s737_s13 = sadd.s32 4294967295, %s690_s12   ;;  %s488_s14 = sadd.s32 4294967294, %s690_s12   ;;  %s690_s12 = sphi %s722_s12, %s904_s12   ;;  %s686_s11 = sphi %s720_s11, %s903_s11   ;;  %s682_s10 = sphi %s718_s10, %s902_s10   ;;  %s678_s9 = sphi %s716_s9, %s901_s9  }
   0x6   : > { %s741_s15 = sadd.s32 1, %s690_s12   ;;  %s51_s16 = sadd.s32 1, %s686_s11 }
   0x7   : > { %s48_s17 = ssub.s32 %s690_s12, %s741_s15  ;;  %p58_p0 = scmp.ne.s32.totalorder %s686_s11, %s682_s10 }
   0x8   : > { %p49_p1 = scmp.eq.s32.totalorder %s48_s17, 0  ;;  %p59_p2 = scmp.eq.s32.totalorder %s690_s12, 0 }
   0x9   : > { %p64_p3 = scmp.ne.s32.totalorder %s682_s10, %s678_s9  ;;  %p65_p4 = scmp.eq.s32.totalorder %s737_s13, 0 }
   0xa   : > { %s753_s18 = scalar_select %p49_p1, %s686_s11, %s51_s16  }
   0xb   : > { %p755_p5 = por %p59_p2, %p58_p0  ;;  %p759_p6 = por %p65_p4, %p64_p3 }
   0xc   : > { %p88_p7 = scmp.eq.s32.totalorder %s737_s13, 1  ;;  %p94_p8 = scmp.eq.s32.totalorder %s488_s14, 1 }
   0xd   : > { %p526_p10 = scmp.lt.s32.totalorder %s690_s12, 2  ;;  %s123_s23 = sand.u32 1, %s686_s11  }
   0xe   : > { %p766_p11 = por %p88_p7, %p58_p0  ;;  %p770_p12 = por %p94_p8, %p64_p3 }
   0xf   : > { %s511_s24 = sshll.u32 %s690_s12, 5  ;;  %s491_s25 = sshll.u32 %s123_s23, 5 }
  0x10   : > { %s133_s28 = scalar_lea.hbm %s893_s1, %s511_s24  ;;  %s127_s30 = scalar_lea.vmem [#allocation2], %s491_s25 }
  0x11   : > { %s134_s29 = sshll.u32 %s133_s28, 4  ;;  %s136_s3 = sshll.u32 %s127_s30, 4  ;;  %s135_s29 = int_to_ptr.hbm [resolvable:$true] %s134_s29  ;;  %s137_s3 = int_to_ptr.vmem [resolvable:$true] %s136_s3 }
  0x12   : > { %p781_p13 = pnand %p526_p10, %p755_p5  ;;  %p495_p0 = scmp.ge.s32.totalorder %s690_s12, 1 }
  0x13   : > { %p144_p1 = scmp.lt.s32.totalorder %s690_s12, 3  ;;  %s124_s5 = scalar_lea.sflag [#allocation3], %s123_s23 }
  0x14   : > { %s594_s6 = sshra.s32 %s135_s29, 4  ;;  %p598_p3 = pneg %p781_p13  ;;  %s595_s6 = int_to_ptr.hbm [resolvable:$true] %s594_s6 }
  0x15   : > { %s596_s7 = scalar_lea.hbm %s595_s6, 32  ;;  %s601_s16 = scalar_lea.hbm %s893_s1, 64 }
  0x16   : > { %p597_p2 = scmp.ne.s32.totalorder %s595_s6, %s596_s7  ;;  %p602_p5 = scmp.lt.s32.totalorder %s595_s6, %s893_s1 }
  0x17   : > { %p603_p8 = scmp.lt.s32.totalorder %s601_s16, %s596_s7 }
  0x18   : > { %p599_p4 = pnand %p598_p3, %p597_p2 }
  0x19   : > { %p604_p10 = por %p603_p8, %p602_p5 }
  0x1a   : > { %p600_p7 = pneg %p599_p4 }
  0x1c   : > { %p605_p9 = pnand %p604_p10, %p600_p7 }
  0x1e   : > { %608 = shalt.err (!%p605_p9)
}
  0x1f   : > { %s692_s23 = smov 256   ;;  %s693_s24 = smov 16  }
  0x20   : > { %521 = dma.hbm_to_vmem [thread:$0]  (!%p781_p13), %s135_s29, 512, %s137_s3, %s124_s5, %s692_s23, %s692_s23, %s693_s24  }
  0x21   : > { %p145_p2 = pnand %p495_p0, %p144_p1 }
  0x22   : > { %s802_s25 = sand.u32 (!%p145_p2), 1, %s682_s10  }
  0x23   : > { %148 = sbr.rel (%p145_p2) target bundleno = 587 (0x24b), region = 28  ;;  %s496_s26 = sshll.u32 (!%p145_p2), %s802_s25, 5 }
  0x24   : > { %s151_s27 = scalar_lea.sflag (!%p145_p2), [#allocation3], %s802_s25  ;;  %s154_s28 = scalar_lea.vmem (!%p145_p2), [#allocation2], %s496_s26 }
  0x28   : > { %669 = dma.done.wait (%p759_p6), %s151_s27, 512  }
  0x29   : > { %671 = vsyncadd (%p759_p6), %s151_s27, 4294966784  ;;  %s498_s29 = sshll.u32 %s737_s13, 1  ;;  %v816_v0 = vld [vmem:[%s154_s28] sm:$0xff]  ;;  %v818_v1 = vld [vmem:[%s154_s28 + $0x8] sm:$0xff]  ;;  %s694_s20 = smov 127   ;;  %v695_v8 = vmov 256.0  }
  0x2a   : > { %p182_p9 = scmp.lt.s32.totalorder %s498_s29, 3  ;;  %v195_v2 = vadd.f32 %v818_v1, %v816_v0  ;;  %v825_v4 = vld [vmem:[%s154_s28 + $0x10] sm:$0xff]  ;;  %v827_v5 = vld [vmem:[%s154_s28 + $0x18] sm:$0xff]  ;;  %572 = vrcp.f32 %v695_v8  ;;  %v696_v29 = vmov 0   ;;  %s697_s6 = smov 1   ;;  %v698_v54 = vmov 1  }
  0x2b   : > { %v198_v6 = vadd.f32 %v827_v5, %v825_v4  ;;  %569 = vset.pattern.permute.xlu2 %v696_v29  ;;  %571 = vset.pattern.permute.xlu0 %v698_v54  ;;  %s850_s7 = scalar_lea.vmem [#allocation5], %s496_s26  ;;  %s513_s8 = sshll.u32 %s737_s13, 5 }
  0x2c   : > { %s906_s29 = smov (!%p182_p9, %s498_s29), 3  ;;  %196 = vadd.xlane.f32.xlu0 %v195_v2  ;;  %s399_s17 = scalar_lea.hbm %s894_s2, %s513_s8 }
  0x2d   : > { %s499_s30 = sshll.u32 %s906_s29, 3  ;;  %s400_s13 = sshll.u32 %s850_s7, 4  ;;  %s401_s13 = int_to_ptr.vmem [resolvable:$true] %s400_s13 }
  0x2e   : > { %s185_s5 = scalar_lea.vmem %s892_s0, %s499_s30  ;;  %s402_s19 = sshll.u32 %s399_s17, 4  ;;  %s403_s19 = int_to_ptr.hbm [resolvable:$true] %s402_s19 }
  0x2f   : > { %v822_v3 = vld [vmem:[%s185_s5] sm:$0xff]  ;;  %v831_v7 = vld [vmem:[%s185_s5 + $0x8] sm:$0xff]  ;;  %s387_s23 = scalar_lea.sflag [#allocation4], %s802_s25  ;;  %s638_s24 = sshra.s32 %s403_s19, 4  ;;  %s639_s24 = int_to_ptr.hbm [resolvable:$true] %s638_s24 }
  0x30   : > { %254 = vrot.lane.b32.xlu2 %v822_v3, %s694_s20  ;;  %v573_v9 = vpop.eup %572  ;;  %s640_s26 = scalar_lea.hbm %s639_s24, 32  ;;  %s644_s29 = scalar_lea.hbm %s894_s2, 64 }
  0x31   : > { %v202_v10 = vmul.f32 256.0, %v573_v9  ;;  %vm206_vm0 = vweird.f32 %v573_v9  ;;  %p641_p6 = scmp.ne.s32.totalorder %s639_s24, %s640_s26  ;;  %p645_p1 = scmp.lt.s32.totalorder %s639_s24, %s894_s2 }
  0x32   : > { %p646_p3 = scmp.lt.s32.totalorder %s644_s29, %s640_s26 }
  0x33   : > { %v203_v11 = vsub.f32 1.0, %v202_v10  ;;  %p642_p13 = pnand %p641_p6, %p766_p11 }
  0x34   : > { %199 = vadd.xlane.f32.xlu0 %v198_v6  ;;  %p647_p4 = por %p646_p3, %p645_p1 }
  0x35   : > { %v204_v12 = vmul.f32 %v573_v9, %v203_v11  ;;  %p643_p0 = pneg %p642_p13 }
  0x37   : > { %v205_v13 = vadd.f32 %v573_v9, %v204_v12  ;;  %p648_p7 = pnand %p647_p4, %p643_p0 }
  0x38   : > { %256 = vrot.lane.b32.xlu2 %v831_v7, %s694_s20 }
  0x39   : > { %v207_v14 = vsel %vm206_vm0, %v573_v9, %v205_v13 }
  0x8a   : > { %v255_v55 = vpop.permute.xlu2 %254 }
  0x92   : > { %v257_v61 = vpop.permute.xlu2 %256 }
  0x9f   : > { %v197_v15 = vpop.xlane.xlu0 %196 }
  0xa0   : > { %v208_v16 = vmul.f32 %v207_v14, %v197_v15 }
  0xa2   : > { %v210_v17 = vsub.f32 %v816_v0, %v208_v16  ;;  %v211_v18 = vsub.f32 %v818_v1, %v208_v16  ;;  %v250_v56 = vmul.f32 %v208_v16, %v822_v3 }
  0xa4   : > { %v214_v19 = vmul.f32 %v210_v17, %v210_v17  ;;  %v215_v20 = vmul.f32 %v211_v18, %v211_v18  ;;  %v260_v57 = vadd.f32 %v255_v55, %v250_v56 }
  0xa6   : > { %v218_v21 = vadd.f32 %v215_v20, %v214_v19 }
  0xa7   : > { %v200_v22 = vpop.xlane.xlu0 %199 }
  0xa8   : > { %v209_v23 = vmul.f32 %v207_v14, %v200_v22  ;;  %219 = vadd.xlane.f32.xlu1 %v218_v21 }
  0xaa   : > { %v212_v24 = vsub.f32 %v825_v4, %v209_v23  ;;  %v213_v25 = vsub.f32 %v827_v5, %v209_v23  ;;  %v251_v60 = vmul.f32 %v209_v23, %v831_v7 }
  0xac   : > { %v216_v26 = vmul.f32 %v212_v24, %v212_v24  ;;  %v217_v27 = vmul.f32 %v213_v25, %v213_v25  ;;  %v261_v62 = vadd.f32 %v257_v61, %v251_v60 }
  0xae   : > { %v221_v28 = vadd.f32 %v217_v27, %v216_v26 }
  0xb0   : > { %222 = vadd.xlane.f32.xlu1 %v221_v28 }
 0x11b   : > { %v220_v30 = vpop.xlane.xlu1 %219 }
 0x11c   : > { %v224_v31 = vmul.f32 %v220_v30, %v207_v14 }
 0x11e   : > { %v226_v32 = vadd.f32 1e-05, %v224_v31 }
 0x120   : > { %574 = vrsqrt.f32 %v226_v32  ;;  %vm234_vm2 = vweird.f32 %v226_v32 }
 0x123   : > { %v223_v33 = vpop.xlane.xlu1 %222 }
 0x124   : > { %v225_v34 = vmul.f32 %v223_v33, %v207_v14 }
 0x126   : > { %v575_v35 = vpop.eup %574  ;;  %v227_v36 = vadd.f32 1e-05, %v225_v34 }
 0x127   : > { %v229_v37 = vmul.f32 %v575_v35, %v226_v32  ;;  %vm235_vm1 = vweird.f32 %v575_v35 }
 0x128   : > { %576 = vrsqrt.f32 %v227_v36  ;;  %vm236_vm3 = vmor %vm234_vm2, %vm235_vm1  ;;  %vm244_vm5 = vweird.f32 %v227_v36 }
 0x129   : > { %v230_v38 = vmul.f32 %v575_v35, %v229_v37 }
 0x12b   : > { %v231_v39 = vmul.f32 0.5, %v230_v38 }
 0x12d   : > { %v232_v40 = vsub.f32 1.5, %v231_v39 }
 0x12e   : > { %v577_v41 = vpop.eup %576 }
 0x12f   : > { %v239_v42 = vmul.f32 %v577_v41, %v227_v36  ;;  %v233_v43 = vmul.f32 %v575_v35, %v232_v40  ;;  %vm245_vm4 = vweird.f32 %v577_v41 }
 0x130   : > { %vm246_vm6 = vmor %vm244_vm5, %vm245_vm4 }
 0x131   : > { %v240_v44 = vmul.f32 %v577_v41, %v239_v42  ;;  %v237_v45 = vsel %vm236_vm3, %v575_v35, %v233_v43 }
 0x132   : > { %v248_v46 = vmul.f32 %v237_v45, %v822_v3 }
 0x133   : > { %v241_v47 = vmul.f32 0.5, %v240_v44 }
 0x134   : > { %276 = vperm.xlu2 %569, %v248_v46   ;;  %v262_v48 = vmul.f32 %v248_v46, %v208_v16 }
 0x135   : > { %v242_v49 = vsub.f32 1.5, %v241_v47 }
 0x136   : > { %266 = vrot.lane.b32.xlu0 %v262_v48, %s697_s6 }
 0x137   : > { %v243_v50 = vmul.f32 %v577_v41, %v242_v49 }
 0x139   : > { %v247_v51 = vsel %vm246_vm6, %v577_v41, %v243_v50 }
 0x13a   : > { %v249_v52 = vmul.f32 %v247_v51, %v831_v7 }
 0x13c   : > { %281 = vperm.xlu2 %569, %v249_v52   ;;  %v263_v53 = vmul.f32 %v249_v52, %v209_v23 }
 0x13e   : > { %268 = vrot.lane.b32.xlu1 %v263_v53, %s697_s6 }
 0x144   : > { %570 = vset.pattern.permute.xlu2 %v698_v54 }
 0x18e   : > { %v277_v6 = vpop.permute.xlu2 %276 }
 0x18f   : > { %v284_v9 = vmul.f32 %v277_v6, %v816_v0  ;;  %v285_v10 = vmul.f32 %v277_v6, %v818_v1 }
 0x196   : > { %v282_v8 = vpop.permute.xlu2 %281 }
 0x197   : > { %v286_v37 = vmul.f32 %v282_v8, %v825_v4  ;;  %v287_v38 = vmul.f32 %v282_v8, %v827_v5 }
 0x1a8   : > { %v267_v58 = vpop.permute.xlu0 %266 }
 0x1a9   : > { %v272_v59 = vsub.f32 %v260_v57, %v267_v58 }
 0x1ab   : > { %290 = vperm.xlu2 %570, %v272_v59  }
 0x1b0   : > { %v269_v63 = vpop.permute.xlu1 %268 }
 0x1b1   : > { %v273_v2 = vsub.f32 %v261_v62, %v269_v63 }
 0x1b3   : > { %295 = vperm.xlu0 %571, %v273_v2  }
 0x205   : > { %v291_v11 = vpop.permute.xlu2 %290 }
 0x206   : > { %v298_v12 = vadd.f32 %v291_v11, %v284_v9  ;;  %v299_v3 = vadd.f32 %v291_v11, %v285_v10 }
 0x208   : > { %v500_v13 = vmul.f32 -1.442695, %v298_v12  ;;  %v501_v14 = vmul.f32 -1.442695, %v299_v3 }
 0x20a   : > { %578 = vpow2.f32 %v500_v13 }
 0x20b   : > { %580 = vpow2.f32 %v501_v14 }
 0x210   : > { %v579_v7 = vpop.eup %578 }
 0x211   : > { %v581_v15 = vpop.eup %580  ;;  %v314_v16 = vadd.f32 1.0, %v579_v7 }
 0x212   : > { %v315_v17 = vadd.f32 1.0, %v581_v15 }
 0x213   : > { %582 = vrcp.f32 %v314_v16  ;;  %v329_v23 = vand.u32 2147483648, %v314_v16  ;;  %v327_v26 = vand.u32 2147483647, %v314_v16  ;;  %vm323_vm9 = vweird.f32 %v314_v16 }
 0x214   : > { %584 = vrcp.f32 %v315_v17  ;;  %v344_v27 = vand.u32 2147483648, %v315_v17  ;;  %v342_v29 = vand.u32 2147483647, %v315_v17  ;;  %vm338_vm11 = vweird.f32 %v315_v17 }
 0x215   : > { %v330_v31 = vor.u32 1.1754944e-38, %v329_v23  ;;  %vm328_vm12 = vcmp.eq.f32.partialorder %v327_v26, 8.507059e+37 }
 0x216   : > { %v345_v34 = vor.u32 1.1754944e-38, %v344_v27  ;;  %vm343_vm14 = vcmp.eq.f32.partialorder %v342_v29, 8.507059e+37 }
 0x219   : > { %v583_v18 = vpop.eup %582 }
 0x21a   : > { %v585_v19 = vpop.eup %584  ;;  %v319_v20 = vmul.f32 %v583_v18, %v314_v16  ;;  %vm324_vm7 = vweird.f32 %v583_v18 }
 0x21b   : > { %v334_v21 = vmul.f32 %v585_v19, %v315_v17  ;;  %vm339_vm8 = vweird.f32 %v585_v19  ;;  %vm325_vm10 = vmor %vm323_vm9, %vm324_vm7 }
 0x21c   : > { %v320_v22 = vsub.f32 1.0, %v319_v20  ;;  %vm340_vm13 = vmor %vm338_vm11, %vm339_vm8 }
 0x21d   : > { %v335_v24 = vsub.f32 1.0, %v334_v21 }
 0x21e   : > { %v321_v25 = vmul.f32 %v583_v18, %v320_v22 }
 0x21f   : > { %v336_v28 = vmul.f32 %v585_v19, %v335_v24 }
 0x220   : > { %v322_v30 = vadd.f32 %v583_v18, %v321_v25 }
 0x221   : > { %v337_v32 = vadd.f32 %v585_v19, %v336_v28 }
 0x222   : > { %v326_v33 = vsel %vm325_vm10, %v583_v18, %v322_v30 }
 0x223   : > { %v331_v35 = vsel %vm328_vm12, %v330_v31, %v326_v33  ;;  %v341_v36 = vsel %vm340_vm13, %v585_v19, %v337_v32 }
 0x224   : > { %v346_v39 = vsel %vm343_vm14, %v345_v34, %v341_v36  ;;  %v378_v40 = vmul.f32 %v331_v35, %v816_v0 }
 0x225   : > { %v379_v41 = vmul.f32 %v346_v39, %v818_v1  ;;  %v296_v42 = vpop.permute.xlu0 %295 }
 0x226   : > { %382 = vst [vmem:[%s850_s7] sm:$0xff] %v378_v40  ;;  %v300_v43 = vadd.f32 %v296_v42, %v286_v37  ;;  %v301_v44 = vadd.f32 %v296_v42, %v287_v38 }
 0x227   : > { %383 = vst [vmem:[%s850_s7 + $0x8] sm:$0xff] %v379_v41 }
 0x228   : > { %v502_v45 = vmul.f32 -1.442695, %v300_v43  ;;  %v503_v46 = vmul.f32 -1.442695, %v301_v44 }
 0x22a   : > { %586 = vpow2.f32 %v502_v45 }
 0x22b   : > { %588 = vpow2.f32 %v503_v46 }
 0x230   : > { %v587_v47 = vpop.eup %586 }
 0x231   : > { %v589_v48 = vpop.eup %588  ;;  %v316_v0 = vadd.f32 1.0, %v587_v47 }
 0x232   : > { %v317_v49 = vadd.f32 1.0, %v589_v48 }
 0x233   : > { %590 = vrcp.f32 %v316_v0  ;;  %v359_v54 = vand.u32 2147483648, %v316_v0  ;;  %v357_v57 = vand.u32 2147483647, %v316_v0  ;;  %vm353_vm1 = vweird.f32 %v316_v0 }
 0x234   : > { %592 = vrcp.f32 %v317_v49  ;;  %v374_v58 = vand.u32 2147483648, %v317_v49  ;;  %v372_v60 = vand.u32 2147483647, %v317_v49  ;;  %vm368_vm3 = vweird.f32 %v317_v49 }
 0x235   : > { %v360_v62 = vor.u32 1.1754944e-38, %v359_v54  ;;  %vm358_vm4 = vcmp.eq.f32.partialorder %v357_v57, 8.507059e+37 }
 0x236   : > { %v375_v6 = vor.u32 1.1754944e-38, %v374_v58  ;;  %vm373_vm6 = vcmp.eq.f32.partialorder %v372_v60, 8.507059e+37 }
 0x239   : > { %v591_v1 = vpop.eup %590 }
 0x23a   : > { %v593_v50 = vpop.eup %592  ;;  %v349_v51 = vmul.f32 %v591_v1, %v316_v0  ;;  %vm354_vm15 = vweird.f32 %v591_v1 }
 0x23b   : > { %v364_v52 = vmul.f32 %v593_v50, %v317_v49  ;;  %vm369_vm0 = vweird.f32 %v593_v50  ;;  %vm355_vm2 = vmor %vm353_vm1, %vm354_vm15 }
 0x23c   : > { %v350_v53 = vsub.f32 1.0, %v349_v51  ;;  %vm370_vm5 = vmor %vm368_vm3, %vm369_vm0 }
 0x23d   : > { %v365_v55 = vsub.f32 1.0, %v364_v52 }
 0x23e   : > { %v351_v56 = vmul.f32 %v591_v1, %v350_v53 }
 0x23f   : > { %v366_v59 = vmul.f32 %v593_v50, %v365_v55 }
 0x240   : > { %v352_v61 = vadd.f32 %v591_v1, %v351_v56 }
 0x241   : > { %v367_v63 = vadd.f32 %v593_v50, %v366_v59 }
 0x242   : > { %v356_v2 = vsel %vm355_vm2, %v591_v1, %v352_v61 }
 0x243   : > { %v361_v8 = vsel %vm358_vm4, %v360_v62, %v356_v2  ;;  %v371_v9 = vsel %vm370_vm5, %v593_v50, %v367_v63 }
 0x244   : > { %v376_v10 = vsel %vm373_vm6, %v375_v6, %v371_v9  ;;  %v380_v11 = vmul.f32 %v361_v8, %v825_v4 }
 0x245   : > { %v381_v12 = vmul.f32 %v376_v10, %v827_v5 }
 0x246   : > { %384 = vst [vmem:[%s850_s7 + $0x10] sm:$0xff] %v380_v11 }
 0x247   : > { %385 = vst [vmem:[%s850_s7 + $0x18] sm:$0xff] %v381_v12 }
 0x248   : > { %651 = shalt.err (!%p648_p7)
}
 0x249   : > { %s699_s25 = smov 256   ;;  %s700_s4 = smov 16  }
 0x24a   : > { %516 = dma.vmem_to_hbm [thread:$0]  (%p766_p11), %s401_s13, 512, %s403_s19, %s387_s23, %s699_s25, %s699_s25, %s700_s4  }
 0x24b PF: > { %s417_s5 = sand.u32 1, %s678_s9   ;;  %p900_p5 = scmp.ge.s32.totalorder %s690_s12, 2 }
 0x24c   : > { %s418_s20 = scalar_lea.sflag [#allocation4], %s417_s5 }
 0x24d   : > { %p523_p8 = pnand %p900_p5, %p770_p12 }
 0x24f   : > { %p524_p10 = pneg %p523_p8 }
 0x251   : > { %673 = dma.done.wait (%p524_p10), %s418_s20, 512  }
 0x252   : > { %675 = vsyncadd (%p524_p10), %s418_s20, 4294966784  ;;  %p15_p2 = scmp.ge.s32.totalorder %s741_s15, 4   ;;  %s901_s9 = smov %s682_s10 }
 0x253   : > { %s902_s10 = smov %s686_s11  ;;  %s903_s11 = smov %s753_s18 }
 0x254   : > { %s904_s12 = smov %s741_s15  ;;  %17 = sbr.rel (!%p15_p2) target bundleno = 5 (0x5), region = 76 }
 0x259   :  { %424 = vsyncpa [#allocation3], 1 }
 0x25a   :  { %426 = vsyncpa [#allocation3 + $0x1], 1 }
 0x25b   :  { %427 = vsyncpa [#allocation4], 1 }
 0x25c   :  { %429 = vsyncpa [#allocation4 + $0x1], 1 }

</bundles_post_ra>
